<compile_context>
chip_gen: v7x
topology: tpu7x:2x2x1
jax: 0.10.0
libtpu: 0.0.40
codegen_flags: <defaults>
</compile_context>

<pallas_src>
import functools

import jax
import jax.numpy as jnp
from jax.experimental import pallas as pl
from jax.experimental.pallas import tpu as pltpu

_LANE = 128
_SUBLANE = 8


def _round_up(a: int, b: int) -> int:
    return (a + b - 1) // b * b


def _mlp_kernel(x_ref, w_in_ref, b_in_ref, w_h_ref, b_h_ref,
                w_out_ref, b_out_ref, o_ref, *, n_hidden_layers, matmul_dtype):
    mm_dt = matmul_dtype if matmul_dtype is not None else x_ref.dtype

    # Hoist bias loads once per grid step (JAX does not CSE broadcast_in_dim).
    b_in = b_in_ref[...]          # (1, H)            f32
    b_h = b_h_ref[...]            # (max(L,1), 1, H)  f32
    b_out = b_out_ref[...]        # (1, d_out)        f32

    # input layer + ReLU (MXU matmul, f32 accumulation)
    x = x_ref[...].astype(mm_dt)
    h = jnp.dot(x, w_in_ref[...], preferred_element_type=jnp.float32) + b_in
    h = jnp.maximum(h, 0.0)

    # hidden layers + ReLU (n_hidden_layers is static -> unrolled)
    for l in range(n_hidden_layers):
        h = jnp.dot(h.astype(mm_dt), w_h_ref[l],
                    preferred_element_type=jnp.float32) + b_h[l]
        h = jnp.maximum(h, 0.0)

    # output layer (output_activation=None in the reference module)
    out = jnp.dot(h.astype(mm_dt), w_out_ref[...],
                  preferred_element_type=jnp.float32) + b_out
    o_ref[...] = out.astype(o_ref.dtype)


def _physical_vmem_bytes() -> int:
    """Per-TensorCore VMEM capacity; conservative fallback = v7x (64 MiB)."""
    try:
        info = pltpu.get_tpu_info()
        cap = getattr(info, "vmem_capacity_bytes", None)
        if cap:
            return int(cap)
    except Exception:
        pass
    return 64 << 20


def mlp_pallas(x, params, *, tile_n=8192, matmul_dtype=jnp.bfloat16,
               out_dtype=None, single_buffer_weights=False,
               vmem_limit_bytes=None):
    """x: (N, input_dim) float32.  params: dict of stacked weights (in, out)."""
    w_in, b_in = params["w_in"], params["b_in"]      # (Din,H), (1,H)
    w_h, b_h = params["w_h"], params["b_h"]          # (L,H,H), (L,1,H)
    w_out, b_out = params["w_out"], params["b_out"]  # (H,Dout), (1,Dout)

    N, d_in = x.shape
    L, H, _ = w_h.shape
    d_out = w_out.shape[1]
    out_dtype = x.dtype if out_dtype is None else jnp.dtype(out_dtype)

    # Empty hidden stack -> pass a 1-deep dummy (never read in the kernel).
    Lb = max(L, 1)
    if L == 0:
        w_h = jnp.zeros((1, H, H), w_h.dtype)
        b_h = jnp.zeros((1, 1, H), b_h.dtype)

    # ---- optional low-precision MXU inputs: cast weights once on the host --
    if matmul_dtype is not None:
        matmul_dtype = jnp.dtype(matmul_dtype)
        w_in = w_in.astype(matmul_dtype)
        w_h = w_h.astype(matmul_dtype)
        w_out = w_out.astype(matmul_dtype)
    w_itemsize = w_in.dtype.itemsize

    # ---- VMEM working-set estimate for a given batch tile ------------------
    def vmem_est(t: int) -> int:
        lpad = lambda v: _round_up(max(int(v), 1), _LANE)
        spad = lambda v: _round_up(max(int(v), 1), _SUBLANE)
        x_blk = t * lpad(d_in) * x.dtype.itemsize            # lane-padded in VMEM
        o_blk = t * lpad(d_out) * jnp.dtype(out_dtype).itemsize
        h_f32 = t * lpad(H) * 4
        h_cast = t * lpad(H) * w_itemsize if w_itemsize != 4 else 0
        w_bytes = (spad(d_in) * lpad(H)
                   + Lb * spad(H) * lpad(H)
                   + spad(H) * lpad(d_out)) * w_itemsize
        b_bytes = ((1 + Lb) * _SUBLANE * lpad(H) + _SUBLANE * lpad(d_out)) * 4
        wt_buf = 1 if single_buffer_weights else 2
        return (2 * x_blk + 2 * o_blk + h_f32 + h_cast
                + wt_buf * (w_bytes + b_bytes))

    # ---- generation-aware batch tiling --------------------------------------
    phys_vmem = _physical_vmem_bytes()
    budget = (3 * phys_vmem) // 4      # ~96 MiB on 128 MiB parts, 48 MiB on v7x

    N8 = _round_up(N, _SUBLANE)
    tile_n = max(_SUBLANE, _round_up(int(tile_n), _SUBLANE))
    while tile_n > 256 and vmem_est(tile_n) > budget:
        tile_n = max(_SUBLANE, _round_up(tile_n // 2, _SUBLANE))
    tile_n = min(tile_n, N8)

    num_tiles = pl.cdiv(N8, tile_n)
    if N8 >= 1024:
        # >=2 (even) grid steps so v7x's two TensorCores both get work.
        num_tiles = max(num_tiles, 2)
        if num_tiles % 2:
            num_tiles += 1
    # Re-derive the tile from ceil(N/num_tiles) so the padded tail is tiny.
    tile_n = _round_up(pl.cdiv(N8, num_tiles), _SUBLANE)
    n_pad = num_tiles * tile_n
    if n_pad != N:
        x = jnp.pad(x, ((0, n_pad - N), (0, 0)))

    # ---- VMEM scoped limit ---------------------------------------------------
    est = vmem_est(tile_n)
    if vmem_limit_bytes is None:
        vmem_limit_bytes = int(min(max(est + (8 << 20), 32 << 20), budget))

    # ---- advisory cost estimate (unpadded output width) ----------------------
    flops = 2 * n_pad * (d_in * H + L * H * H + H * d_out)
    bytes_accessed = (
        n_pad * d_in * x.dtype.itemsize
        + n_pad * d_out * jnp.dtype(out_dtype).itemsize
        + (w_in.size + w_h.size + w_out.size) * w_itemsize
        + (b_in.size + b_h.size + b_out.size) * 4)

    # ---- block specs ----------------------------------------------------------
    wt_mode = pl.Buffered(1) if single_buffer_weights else None

    def const_spec(shape):
        imap = (lambda i: (0, 0)) if len(shape) == 2 else (lambda i: (0, 0, 0))
        if wt_mode is None:
            return pl.BlockSpec(shape, imap)
        return pl.BlockSpec(shape, imap, pipeline_mode=wt_mode)

    kernel = functools.partial(_mlp_kernel, n_hidden_layers=L,
                               matmul_dtype=matmul_dtype)

    out = pl.pallas_call(
        kernel,
        out_shape=jax.ShapeDtypeStruct((n_pad, d_out), out_dtype),
        grid_spec=pltpu.PrefetchScalarGridSpec(
            num_scalar_prefetch=0,
            grid=(num_tiles,),
            in_specs=[
                pl.BlockSpec((tile_n, d_in), lambda i: (i, 0)),
                const_spec((d_in, H)),
                const_spec((1, H)),
                const_spec((Lb, H, H)),
                const_spec((Lb, 1, H)),
                const_spec((H, d_out)),
                const_spec((1, d_out)),
            ],
            # Unpadded output block: last dim equals the full array dim, so no
            # 128-lane write blowup and no padded-slab slice pass afterwards.
            out_specs=pl.BlockSpec((tile_n, d_out), lambda i: (i, 0)),
        ),
        compiler_params=pltpu.CompilerParams(
            dimension_semantics=("parallel",),
            vmem_limit_bytes=vmem_limit_bytes),
        cost_estimate=pl.CostEstimate(flops=int(flops), transcendentals=0,
                                      bytes_accessed=int(bytes_accessed)),
    )(x, w_in, b_in, w_h, b_h, w_out, b_out)

    return out if n_pad == N else out[:N]


def init_mlp_params(key, input_dim, hidden_dim, output_dim, n_hidden_layers,
                    dtype=jnp.float32):
    """Deterministic PyTorch-style (uniform +-1/sqrt(fan_in)) init."""
    def linear(k, fan_in, fan_out):
        kw, kb = jax.random.split(k)
        bound = 1.0 / jnp.sqrt(fan_in)
        # stored already transposed: (in, out) so y = x @ W + b
        w = jax.random.uniform(kw, (fan_in, fan_out), dtype, -bound, bound)
        b = jax.random.uniform(kb, (1, fan_out), dtype, -bound, bound)
        return w, b

    keys = jax.random.split(key, 2 + n_hidden_layers)
    w_in, b_in = linear(keys[0], input_dim, hidden_dim)
    w_hs, b_hs = [], []
    for l in range(n_hidden_layers):
        w, b = linear(keys[1 + l], hidden_dim, hidden_dim)
        w_hs.append(w)
        b_hs.append(b)
    w_out, b_out = linear(keys[-1], hidden_dim, output_dim)
    return {
        "w_in": w_in, "b_in": b_in,
        "w_h": jnp.stack(w_hs, axis=0),           # (L, H, H)
        "b_h": jnp.stack(b_hs, axis=0),           # (L, 1, H)
        "w_out": w_out, "b_out": b_out,
    }


def mlp_reference(x, params):
    h = jnp.maximum(x @ params["w_in"] + params["b_in"], 0.0)
    for l in range(params["w_h"].shape[0]):
        h = jnp.maximum(h @ params["w_h"][l] + params["b_h"][l], 0.0)
    return h @ params["w_out"] + params["b_out"]


if __name__ == "__main__":
    # Small shapes consistent with the module's forward:
    # batch of 64 points, input_dim=4, hidden_dim=32, output_dim=3, 2 hidden layers.
    input_dim, hidden_dim, output_dim, n_hidden_layers = 4, 32, 3, 2
    N = 64

    key = jax.random.PRNGKey(0)
    kx, kp = jax.random.split(key)
    x = jax.random.normal(kx, (N, input_dim), dtype=jnp.float32)
    params = init_mlp_params(kp, input_dim, hidden_dim, output_dim,
                             n_hidden_layers)

    ref = mlp_reference(x, params)

    # Default fast path: bf16 MXU inputs, f32 accumulation -> loose tolerance.
    out = jax.block_until_ready(mlp_pallas(x, params))
    assert out.shape == (N, output_dim)
    assert jnp.allclose(out, ref, atol=5e-2, rtol=5e-2), \
        "bf16 path mismatch vs reference"

    # Exact f32 matmul path.
    out_f32 = jax.block_until_ready(mlp_pallas(x, params, matmul_dtype=None))
    assert out_f32.shape == (N, output_dim)
    assert jnp.allclose(out_f32, ref, atol=1e-5, rtol=1e-5), \
        "f32 path mismatch vs reference"

    print("KERNEL_OK")
</pallas_src>

<mosaic_0001>
module attributes {stable_mosaic.version = 11 : i64} {
  func.func @_mlp_kernel(%arg0: i32, %arg1: memref<64x4xf32, #tpu.memory_space<vmem>>, %arg2: memref<4x32xbf16, #tpu.memory_space<vmem>>, %arg3: memref<1x32xf32, #tpu.memory_space<vmem>>, %arg4: memref<2x32x32xbf16, #tpu.memory_space<vmem>>, %arg5: memref<2x1x32xf32, #tpu.memory_space<vmem>>, %arg6: memref<32x3xbf16, #tpu.memory_space<vmem>>, %arg7: memref<1x3xf32, #tpu.memory_space<vmem>>, %arg8: memref<64x3xf32, #tpu.memory_space<vmem>>) attributes {dimension_semantics = [#tpu.dimension_semantics<parallel>], iteration_bounds = array<i64: 1>, scalar_prefetch = 0 : i64, scratch_operands = 0 : i64, tpu.core_type = #tpu.core_type<tc>, window_params = [{transform_indices = @transform_0, window_bounds = array<i64: 64, 4>}, {pipeline_mode = #tpu.pipeline_mode<synchronous>, transform_indices = @transform_1, window_bounds = array<i64: 4, 32>}, {pipeline_mode = #tpu.pipeline_mode<synchronous>, transform_indices = @transform_2, window_bounds = array<i64: 1, 32>}, {pipeline_mode = #tpu.pipeline_mode<synchronous>, transform_indices = @transform_3, window_bounds = array<i64: 2, 32, 32>}, {pipeline_mode = #tpu.pipeline_mode<synchronous>, transform_indices = @transform_4, window_bounds = array<i64: 2, 1, 32>}, {pipeline_mode = #tpu.pipeline_mode<synchronous>, transform_indices = @transform_5, window_bounds = array<i64: 32, 3>}, {pipeline_mode = #tpu.pipeline_mode<synchronous>, transform_indices = @transform_6, window_bounds = array<i64: 1, 3>}, {transform_indices = @transform_7, window_bounds = array<i64: 64, 3>}]} {
    %c0 = arith.constant 0 : index
    %c0_0 = arith.constant 0 : index
    %0 = vector.load %arg3[%c0, %c0_0] : memref<1x32xf32, #tpu.memory_space<vmem>>, vector<1x32xf32>
    %c0_1 = arith.constant 0 : index
    %c0_2 = arith.constant 0 : index
    %c0_3 = arith.constant 0 : index
    %1 = vector.load %arg5[%c0_1, %c0_2, %c0_3] : memref<2x1x32xf32, #tpu.memory_space<vmem>>, vector<2x1x32xf32>
    %c0_4 = arith.constant 0 : index
    %c0_5 = arith.constant 0 : index
    %2 = vector.load %arg7[%c0_4, %c0_5] : memref<1x3xf32, #tpu.memory_space<vmem>>, vector<1x3xf32>
    %c0_6 = arith.constant 0 : index
    %c0_7 = arith.constant 0 : index
    %3 = vector.load %arg1[%c0_6, %c0_7] : memref<64x4xf32, #tpu.memory_space<vmem>>, vector<64x4xf32>
    %4 = arith.truncf %3 : vector<64x4xf32> to vector<64x4xbf16>
    %c0_8 = arith.constant 0 : index
    %c0_9 = arith.constant 0 : index
    %5 = vector.load %arg2[%c0_8, %c0_9] : memref<4x32xbf16, #tpu.memory_space<vmem>>, vector<4x32xbf16>
    %cst = arith.constant dense<0.000000e+00> : vector<64x32xf32>
    %6 = tpu.matmul %4, %5, %cst {dimension_numbers = #tpu.dot_dimension_numbers<[1], [0], [0], [1], [0, 0, 1, 1], [], []>} : vector<64x4xbf16>, vector<4x32xbf16>, vector<64x32xf32> -> vector<64x32xf32>
    %7 = vector.broadcast %0 : vector<1x32xf32> to vector<64x32xf32>
    %8 = arith.addf %6, %7 : vector<64x32xf32>
    %cst_10 = arith.constant 0.000000e+00 : f32
    %9 = vector.broadcast %cst_10 : f32 to vector<64x32xf32>
    %10 = arith.maximumf %8, %9 : vector<64x32xf32>
    %11 = arith.truncf %10 : vector<64x32xf32> to vector<64x32xbf16>
    %c0_11 = arith.constant 0 : index
    %c0_12 = arith.constant 0 : index
    %c0_13 = arith.constant 0 : index
    %12 = vector.load %arg4[%c0_11, %c0_12, %c0_13] : memref<2x32x32xbf16, #tpu.memory_space<vmem>>, vector<1x32x32xbf16>
    %13 = vector.shape_cast %12 : vector<1x32x32xbf16> to vector<32x32xbf16>
    %cst_14 = arith.constant dense<0.000000e+00> : vector<64x32xf32>
    %14 = tpu.matmul %11, %13, %cst_14 {dimension_numbers = #tpu.dot_dimension_numbers<[1], [0], [0], [1], [0, 0, 1, 1], [], []>} : vector<64x32xbf16>, vector<32x32xbf16>, vector<64x32xf32> -> vector<64x32xf32>
    %15 = vector.extract_strided_slice %1 {offsets = [0, 0, 0], sizes = [1, 1, 32], strides = [1, 1, 1]} : vector<2x1x32xf32> to vector<1x1x32xf32>
    %16 = vector.shape_cast %15 : vector<1x1x32xf32> to vector<1x32xf32>
    %17 = vector.broadcast %16 : vector<1x32xf32> to vector<64x32xf32>
    %18 = arith.addf %14, %17 : vector<64x32xf32>
    %cst_15 = arith.constant 0.000000e+00 : f32
    %19 = vector.broadcast %cst_15 : f32 to vector<64x32xf32>
    %20 = arith.maximumf %18, %19 : vector<64x32xf32>
    %21 = arith.truncf %20 : vector<64x32xf32> to vector<64x32xbf16>
    %c1 = arith.constant 1 : index
    %c0_16 = arith.constant 0 : index
    %c0_17 = arith.constant 0 : index
    %22 = vector.load %arg4[%c1, %c0_16, %c0_17] : memref<2x32x32xbf16, #tpu.memory_space<vmem>>, vector<1x32x32xbf16>
    %23 = vector.shape_cast %22 : vector<1x32x32xbf16> to vector<32x32xbf16>
    %cst_18 = arith.constant dense<0.000000e+00> : vector<64x32xf32>
    %24 = tpu.matmul %21, %23, %cst_18 {dimension_numbers = #tpu.dot_dimension_numbers<[1], [0], [0], [1], [0, 0, 1, 1], [], []>} : vector<64x32xbf16>, vector<32x32xbf16>, vector<64x32xf32> -> vector<64x32xf32>
    %25 = vector.extract_strided_slice %1 {offsets = [1, 0, 0], sizes = [1, 1, 32], strides = [1, 1, 1]} : vector<2x1x32xf32> to vector<1x1x32xf32>
    %26 = vector.shape_cast %25 : vector<1x1x32xf32> to vector<1x32xf32>
    %27 = vector.broadcast %26 : vector<1x32xf32> to vector<64x32xf32>
    %28 = arith.addf %24, %27 : vector<64x32xf32>
    %cst_19 = arith.constant 0.000000e+00 : f32
    %29 = vector.broadcast %cst_19 : f32 to vector<64x32xf32>
    %30 = arith.maximumf %28, %29 : vector<64x32xf32>
    %31 = arith.truncf %30 : vector<64x32xf32> to vector<64x32xbf16>
    %c0_20 = arith.constant 0 : index
    %c0_21 = arith.constant 0 : index
    %32 = vector.load %arg6[%c0_20, %c0_21] : memref<32x3xbf16, #tpu.memory_space<vmem>>, vector<32x3xbf16>
    %cst_22 = arith.constant dense<0.000000e+00> : vector<64x3xf32>
    %33 = tpu.matmul %31, %32, %cst_22 {dimension_numbers = #tpu.dot_dimension_numbers<[1], [0], [0], [1], [0, 0, 1, 1], [], []>} : vector<64x32xbf16>, vector<32x3xbf16>, vector<64x3xf32> -> vector<64x3xf32>
    %34 = vector.broadcast %2 : vector<1x3xf32> to vector<64x3xf32>
    %35 = arith.addf %33, %34 : vector<64x3xf32>
    %c0_23 = arith.constant 0 : index
    %c0_24 = arith.constant 0 : index
    %36 = vector.load %arg8[%c0_23, %c0_24] : memref<64x3xf32, #tpu.memory_space<vmem>>, vector<64x3xf32>
    tpu.vector_store %arg8[%c0_23, %c0_24], %35 {strides = array<i32>} : memref<64x3xf32, #tpu.memory_space<vmem>>, vector<64x3xf32>,
    return
  }
  func.func @transform_0(%arg0: i32) -> (i32, i32) {
    %c0_i32 = arith.constant 0 : i32
    %c0_i32_0 = arith.constant 0 : i32
    return %arg0, %c0_i32 : i32, i32
  }
  func.func @transform_1(%arg0: i32) -> (i32, i32) {
    %c0_i32 = arith.constant 0 : i32
    %c0_i32_0 = arith.constant 0 : i32
    %c0_i32_1 = arith.constant 0 : i32
    return %c0_i32, %c0_i32_0 : i32, i32
  }
  func.func @transform_2(%arg0: i32) -> (i32, i32) {
    %c0_i32 = arith.constant 0 : i32
    %c0_i32_0 = arith.constant 0 : i32
    %c0_i32_1 = arith.constant 0 : i32
    return %c0_i32, %c0_i32_0 : i32, i32
  }
  func.func @transform_3(%arg0: i32) -> (i32, i32, i32) {
    %c0_i32 = arith.constant 0 : i32
    %c0_i32_0 = arith.constant 0 : i32
    %c0_i32_1 = arith.constant 0 : i32
    %c0_i32_2 = arith.constant 0 : i32
    return %c0_i32, %c0_i32_0, %c0_i32_1 : i32, i32, i32
  }
  func.func @transform_4(%arg0: i32) -> (i32, i32, i32) {
    %c0_i32 = arith.constant 0 : i32
    %c0_i32_0 = arith.constant 0 : i32
    %c0_i32_1 = arith.constant 0 : i32
    %c0_i32_2 = arith.constant 0 : i32
    return %c0_i32, %c0_i32_0, %c0_i32_1 : i32, i32, i32
  }
  func.func @transform_5(%arg0: i32) -> (i32, i32) {
    %c0_i32 = arith.constant 0 : i32
    %c0_i32_0 = arith.constant 0 : i32
    %c0_i32_1 = arith.constant 0 : i32
    return %c0_i32, %c0_i32_0 : i32, i32
  }
  func.func @transform_6(%arg0: i32) -> (i32, i32) {
    %c0_i32 = arith.constant 0 : i32
    %c0_i32_0 = arith.constant 0 : i32
    %c0_i32_1 = arith.constant 0 : i32
    return %c0_i32, %c0_i32_0 : i32, i32
  }
  func.func @transform_7(%arg0: i32) -> (i32, i32) {
    %c0_i32 = arith.constant 0 : i32
    %c0_i32_0 = arith.constant 0 : i32
    return %arg0, %c0_i32 : i32, i32
  }
}

</mosaic_0001>

<bundles_post_ra>
// kernel: tpu_custom_call.1
= control target key start
LH: loop header
LB: loop body
LE: loop exit
PB: predicated region body
PF: predicated region fallthrough
CT: control target
= control target key end

     0   :  { %vm63_vm0 = vcmask 1041408   ;;  %vm50_vm1 = vcmask 31744   ;;  %vm166_vm2 = vcmask 261120   ;;  %vm467_vm3 = vcmask 23552   ;;  %s731_s1 = inlined_call_operand.vmem [shape: bf16[4,32], index: 1, kind: input, shape index: {}]   ;;  %s732_s0 = inlined_call_operand.vmem [shape: f32[64,4], index: 0, kind: input, shape index: {}]   ;;  %s733_s3 = inlined_call_operand.vmem [shape: bf16[2,32,32], index: 3, kind: input, shape index: {}]   ;;  %s734_s2 = inlined_call_operand.vmem [shape: f32[1,32], index: 2, kind: input, shape index: {}]   ;;  %s735_s5 = inlined_call_operand.vmem [shape: bf16[32,3], index: 5, kind: input, shape index: {}]   ;;  %s736_s4 = inlined_call_operand.vmem [shape: f32[2,1,32], index: 4, kind: input, shape index: {}]   ;;  %s737_s6 = inlined_call_operand.vmem [shape: f32[1,3], index: 6, kind: input, shape index: {}]   ;;  %s738_s7 = inlined_call_operand.vmem [shape: f32[64,3], index: 7, kind: output, shape index: {}]  }
   0x1   :  { %v43_v0 = vld [vmem:[%s731_s1] sm:$0x3]  ;;  %v32_v2 = vld [vmem:[%s732_s0 + $0x8] sm:$0xff]  ;;  %v33_v5 = vld [vmem:[%s732_s0 + $0x10] sm:$0xff] }
   0x2   :  { %v31_v1 = vld [vmem:[%s732_s0] sm:$0xff]  ;;  %579 = vmatprep.subr.msk.bf16.mxu0 %vm63_vm0, %v43_v0  ;;  %v65_v3 = vsel %vm63_vm0, %v43_v0, 0  ;;  %v34_v6 = vld [vmem:[%s732_s0 + $0x18] sm:$0xff]  ;;  %v36_v9 = vld [vmem:[%s732_s0 + $0x28] sm:$0xff] }
   0x3   :  { %v39_v4 = vpack.c.bf16 %v32_v2, %v31_v1  ;;  %v35_v7 = vld [vmem:[%s732_s0 + $0x20] sm:$0xff]  ;;  %534 = vmatpush3.bf16.msra.mxu0 %v65_v3  ;;  %v40_v8 = vpack.c.bf16 %v34_v6, %v33_v5  ;;  %v37_v11 = vld [vmem:[%s732_s0 + $0x30] sm:$0xff]  ;;  %v38_v12 = vld [vmem:[%s732_s0 + $0x38] sm:$0xff] }
   0x4   :  { %v41_v10 = vpack.c.bf16 %v36_v9, %v35_v7  ;;  %v42_v13 = vpack.c.bf16 %v38_v12, %v37_v11  ;;  %v580_v14 = vld [vmem:[%s733_s3] sm:$0xff]   ;;  %v581_v15 = vld [vmem:[%s733_s3 + $0x8] sm:$0xff]   ;;  %v582_v16 = vld [vmem:[%s733_s3 + $0x10] sm:$0xff]  }
   0x5   :  { %535 = vmatprep.mubr.msk.bf16.mxu0 %vm50_vm1, %v39_v4  ;;  %543 = vmatprep.subr.bf16.mxu1 %v580_v14  ;;  %v480_v17 = vld [vmem:[%s734_s2] ss:$0 sm:$0xff]  ;;  %v583_v46 = vld [vmem:[%s733_s3 + $0x18] sm:$0xff]  }
   0x6   :  { %536 = vmatmul.mubr.msk.bf16.vlgmr.msra.gmra.mrb[0].mxu0 %vm50_vm1, %v40_v8  ;;  %544 = vmatpush3.bf16.msra.mxu1 %v580_v14  ;;  %v584_v47 = vld [vmem:[%s735_s5] sm:$0xff]  }
   0x7   :  { %539 = vmatprep.mubr.msk.bf16.mxu0 %vm50_vm1, %v41_v10  ;;  %545 = vmatprep.subr.bf16.mxu1 %v581_v15  ;;  %v485_v48 = vld [vmem:[%s736_s4] ss:$0 sm:$0xff]  ;;  %v496_v14 = vld [vmem:[%s736_s4 + $0x1] ss:$0 sm:$0xff] }
   0x8   :  { %555 = vmatprep.subr.bf16.mxu0 %v582_v16 }
   0x9   :  { %556 = vmatpush3.bf16.msra.mxu0 %v582_v16 }
   0xa   :  { %546 = vmatpush3.bf16.msra.mxu1 %v581_v15  ;;  %557 = vmatprep.subr.bf16.mxu0 %v583_v46 }
   0xb   :  { %567 = vmatprep.subr.bf16.mxu1 %v584_v47 }
   0xd   :  { %558 = vmatpush3.bf16.msra.mxu0 %v583_v46 }
   0xe   :  { %540 = vmatmul.mubr.msk.bf16.gmra.mrb[4].mxu0 %vm50_vm1, %v42_v13  ;;  %v585_v13 = vld [vmem:[%s735_s5 + $0x8] sm:$0xff]  }
  0xd9   :  { %v537_v18 = vpop.f32.mrb[0].mxu0 }
  0xda   :  { %v110_v19 = vadd.f32 %v537_v18, %v480_v17  ;;  %v101_v20 = vpop.f32.mrb[1].mxu0 }
  0xdb   :  { %v102_v21 = vadd.f32 %v480_v17, %v101_v20  ;;  %v538_v22 = vpop.f32.mrb[2].mxu0 }
  0xdc   :  { %v113_v23 = vadd.f32 %v538_v22, %v480_v17  ;;  %v104_v24 = vpop.f32.mrb[3].mxu0  ;;  %v134_v26 = vmax.f32 %v110_v19, 0.0 }
  0xdd   :  { %v105_v25 = vadd.f32 %v480_v17, %v104_v24  ;;  %v132_v28 = vmax.f32 %v102_v21, 0.0 }
  0xde   :  { %v135_v27 = vmax.f32 %v113_v23, 0.0 }
  0xdf   :  { %v133_v29 = vmax.f32 %v105_v25, 0.0 }
  0xe0   :  { %v141_v30 = vpack.c.bf16 %v135_v27, %v134_v26 }
  0xe1   :  { %v541_v31 = vpop.f32.mrb[4].mxu0  ;;  %v140_v32 = vpack.c.bf16 %v133_v29, %v132_v28 }
  0xe2   :  { %v126_v33 = vadd.f32 %v541_v31, %v480_v17  ;;  %v117_v34 = vpop.f32.mrb[5].mxu0 }
  0xe3   :  { %v118_v35 = vadd.f32 %v480_v17, %v117_v34  ;;  %v542_v36 = vpop.f32.mrb[6].mxu0  ;;  %547 = vmatprep.mubr.msk.bf16.mxu1 %vm166_vm2, %v140_v32 }
  0xe4   :  { %v129_v37 = vadd.f32 %v542_v36, %v480_v17  ;;  %v120_v38 = vpop.f32.mrb[7].mxu0  ;;  %548 = vmatmul.mubr.msk.bf16.vlgmr.msra.gmra.mrb[0].mxu1 %vm166_vm2, %v141_v30  ;;  %v138_v40 = vmax.f32 %v126_v33, 0.0 }
  0xe5   :  { %v121_v39 = vadd.f32 %v480_v17, %v120_v38  ;;  %v136_v42 = vmax.f32 %v118_v35, 0.0  ;;  %568 = vmatpush3.bf16.msra.mxu1 %v584_v47 }
  0xe6   :  { %v139_v41 = vmax.f32 %v129_v37, 0.0  ;;  %569 = vmatprep.subr.bf16.mxu1 %v585_v13 }
  0xe7   :  { %v137_v43 = vmax.f32 %v121_v39, 0.0 }
  0xe8   :  { %v143_v44 = vpack.c.bf16 %v139_v41, %v138_v40 }
  0xe9   :  { %v142_v45 = vpack.c.bf16 %v137_v43, %v136_v42  ;;  %570 = vmatpush3.bf16.msra.mxu1 %v585_v13  ;;  %v503_v43 = vld [vmem:[%s737_s6] ss:$0 sm:$0xff] }
  0xeb   :  { %551 = vmatprep.mubr.msk.bf16.mxu1 %vm166_vm2, %v142_v45 }
  0xec   :  { %552 = vmatmul.mubr.msk.bf16.gmra.mrb[4].mxu1 %vm166_vm2, %v143_v44 }
 0x1b7   :  { %v549_v49 = vpop.f32.mrb[0].mxu1 }
 0x1b8   :  { %v222_v50 = vadd.f32 %v549_v49, %v485_v48  ;;  %v213_v51 = vpop.f32.mrb[1].mxu1 }
 0x1b9   :  { %v214_v52 = vadd.f32 %v485_v48, %v213_v51  ;;  %v550_v53 = vpop.f32.mrb[2].mxu1 }
 0x1ba   :  { %v225_v54 = vadd.f32 %v550_v53, %v485_v48  ;;  %v216_v55 = vpop.f32.mrb[3].mxu1  ;;  %v246_v57 = vmax.f32 %v222_v50, 0.0 }
 0x1bb   :  { %v217_v56 = vadd.f32 %v485_v48, %v216_v55  ;;  %v244_v59 = vmax.f32 %v214_v52, 0.0 }
 0x1bc   :  { %v247_v58 = vmax.f32 %v225_v54, 0.0 }
 0x1bd   :  { %v245_v60 = vmax.f32 %v217_v56, 0.0 }
 0x1be   :  { %v253_v61 = vpack.c.bf16 %v247_v58, %v246_v57 }
 0x1bf   :  { %v252_v62 = vpack.c.bf16 %v245_v60, %v244_v59  ;;  %v553_v63 = vpop.f32.mrb[4].mxu1 }
 0x1c0   :  { %v238_v0 = vadd.f32 %v553_v63, %v485_v48  ;;  %v229_v1 = vpop.f32.mrb[5].mxu1 }
 0x1c1   :  { %v230_v2 = vadd.f32 %v485_v48, %v229_v1  ;;  %v554_v3 = vpop.f32.mrb[6].mxu1  ;;  %559 = vmatprep.mubr.msk.bf16.mxu0 %vm166_vm2, %v252_v62 }
 0x1c2   :  { %v241_v4 = vadd.f32 %v554_v3, %v485_v48  ;;  %v232_v5 = vpop.f32.mrb[7].mxu1  ;;  %560 = vmatmul.mubr.msk.bf16.vlgmr.msra.gmra.mrb[8].mxu0 %vm166_vm2, %v253_v61  ;;  %v250_v7 = vmax.f32 %v238_v0, 0.0 }
 0x1c3   :  { %v233_v6 = vadd.f32 %v485_v48, %v232_v5  ;;  %v248_v9 = vmax.f32 %v230_v2, 0.0 }
 0x1c4   :  { %v251_v8 = vmax.f32 %v241_v4, 0.0 }
 0x1c5   :  { %v249_v10 = vmax.f32 %v233_v6, 0.0 }
 0x1c6   :  { %v255_v11 = vpack.c.bf16 %v251_v8, %v250_v7 }
 0x1c7   :  { %v254_v12 = vpack.c.bf16 %v249_v10, %v248_v9 }
 0x1c9   :  { %563 = vmatprep.mubr.msk.bf16.mxu0 %vm166_vm2, %v254_v12 }
 0x1ca   :  { %564 = vmatmul.mubr.msk.bf16.gmra.mrb[12].mxu0 %vm166_vm2, %v255_v11 }
 0x295   :  { %v561_v15 = vpop.f32.mrb[8].mxu0 }
 0x296   :  { %v334_v16 = vadd.f32 %v561_v15, %v496_v14  ;;  %v325_v17 = vpop.f32.mrb[9].mxu0 }
 0x297   :  { %v326_v18 = vadd.f32 %v496_v14, %v325_v17  ;;  %v562_v19 = vpop.f32.mrb[10].mxu0 }
 0x298   :  { %v337_v20 = vadd.f32 %v562_v19, %v496_v14  ;;  %v328_v21 = vpop.f32.mrb[11].mxu0  ;;  %v358_v23 = vmax.f32 %v334_v16, 0.0 }
 0x299   :  { %v329_v22 = vadd.f32 %v496_v14, %v328_v21  ;;  %v356_v25 = vmax.f32 %v326_v18, 0.0 }
 0x29a   :  { %v359_v24 = vmax.f32 %v337_v20, 0.0 }
 0x29b   :  { %v357_v26 = vmax.f32 %v329_v22, 0.0 }
 0x29c   :  { %v365_v27 = vpack.c.bf16 %v359_v24, %v358_v23 }
 0x29d   :  { %v364_v28 = vpack.c.bf16 %v357_v26, %v356_v25  ;;  %v565_v29 = vpop.f32.mrb[12].mxu0 }
 0x29e   :  { %v350_v30 = vadd.f32 %v565_v29, %v496_v14  ;;  %v341_v31 = vpop.f32.mrb[13].mxu0 }
 0x29f   :  { %v342_v32 = vadd.f32 %v496_v14, %v341_v31  ;;  %v566_v33 = vpop.f32.mrb[14].mxu0  ;;  %571 = vmatprep.mubr.msk.bf16.mxu1 %vm166_vm2, %v364_v28 }
 0x2a0   :  { %v353_v34 = vadd.f32 %v566_v33, %v496_v14  ;;  %v344_v35 = vpop.f32.mrb[15].mxu0  ;;  %572 = vmatmul.mubr.msk.bf16.vlgmr.msra.gmra.mrb[8].mxu1 %vm166_vm2, %v365_v27  ;;  %v362_v37 = vmax.f32 %v350_v30, 0.0 }
 0x2a1   :  { %v345_v36 = vadd.f32 %v496_v14, %v344_v35  ;;  %v360_v39 = vmax.f32 %v342_v32, 0.0 }
 0x2a2   :  { %v363_v38 = vmax.f32 %v353_v34, 0.0 }
 0x2a3   :  { %v361_v40 = vmax.f32 %v345_v36, 0.0 }
 0x2a4   :  { %v367_v41 = vpack.c.bf16 %v363_v38, %v362_v37 }
 0x2a5   :  { %v366_v42 = vpack.c.bf16 %v361_v40, %v360_v39 }
 0x2a7   :  { %575 = vmatprep.mubr.msk.bf16.mxu1 %vm166_vm2, %v366_v42 }
 0x2a8   :  { %576 = vmatmul.mubr.msk.bf16.gmra.mrb[12].mxu1 %vm166_vm2, %v367_v41 }
 0x373   :  { %v573_v44 = vpop.f32.mrb[8].mxu1 }
 0x374   :  { %v445_v45 = vadd.f32 %v573_v44, %v503_v43  ;;  %v436_v46 = vpop.f32.mrb[9].mxu1 }
 0x375   :  { %v437_v47 = vadd.f32 %v503_v43, %v436_v46  ;;  %v574_v48 = vpop.f32.mrb[10].mxu1 }
 0x376   :  { %470 = vst.msk [vmem:[%s738_s7 + $0x10] sm:$0xff] %vm467_vm3, %v445_v45  ;;  %v448_v49 = vadd.f32 %v574_v48, %v503_v43  ;;  %v439_v50 = vpop.f32.mrb[11].mxu1 }
 0x377   :  { %468 = vst.msk [vmem:[%s738_s7] sm:$0xff] %vm467_vm3, %v437_v47  ;;  %v440_v51 = vadd.f32 %v503_v43, %v439_v50 }
 0x378   :  { %471 = vst.msk [vmem:[%s738_s7 + $0x18] sm:$0xff] %vm467_vm3, %v448_v49 }
 0x379   :  { %469 = vst.msk [vmem:[%s738_s7 + $0x8] sm:$0xff] %vm467_vm3, %v440_v51 }
 0x37b   :  { %v577_v52 = vpop.f32.mrb[12].mxu1 }
 0x37c   :  { %v461_v53 = vadd.f32 %v577_v52, %v503_v43  ;;  %v452_v54 = vpop.f32.mrb[13].mxu1 }
 0x37d   :  { %v453_v55 = vadd.f32 %v503_v43, %v452_v54  ;;  %v578_v56 = vpop.f32.mrb[14].mxu1 }
 0x37e   :  { %474 = vst.msk [vmem:[%s738_s7 + $0x30] sm:$0xff] %vm467_vm3, %v461_v53  ;;  %v464_v57 = vadd.f32 %v578_v56, %v503_v43  ;;  %v455_v58 = vpop.f32.mrb[15].mxu1 }
 0x37f   :  { %472 = vst.msk [vmem:[%s738_s7 + $0x20] sm:$0xff] %vm467_vm3, %v453_v55  ;;  %v456_v59 = vadd.f32 %v503_v43, %v455_v58 }
 0x380   :  { %475 = vst.msk [vmem:[%s738_s7 + $0x38] sm:$0xff] %vm467_vm3, %v464_v57 }
 0x381   :  { %473 = vst.msk [vmem:[%s738_s7 + $0x28] sm:$0xff] %vm467_vm3, %v456_v59 }

</bundles_post_ra>
